<compile_context>
chip_gen: v5e
topology: v5e:2x2
jax: 0.10.0
libtpu: 0.0.40
codegen_flags: <defaults>
</compile_context>

<pallas_src>
import jax
import jax.numpy as jnp
from jax.experimental import pallas as pl
from jax.experimental.pallas import tpu as pltpu

_NEG_BIG = -1e30  # finite "-inf" for padded class columns (exp underflows to 0)


def _round_up(x, m):
    return ((x + m - 1) // m) * m


def _pad_to(arr, axis, size, value=0):
    pad = size - arr.shape[axis]
    if pad == 0:
        return arr
    widths = [(0, 0)] * arr.ndim
    widths[axis] = (0, pad)
    return jnp.pad(arr, widths, constant_values=value)


def _vmem_capacity_bytes():
    """Per-TensorCore VMEM capacity; generation-aware with conservative fallback."""
    try:
        return int(pltpu.get_tpu_info().vmem_capacity_bytes)
    except Exception:
        pass
    try:
        kind = jax.devices()[0].device_kind.lower()
        if "v7" in kind or "7x" in kind:
            return 64 << 20            # v7x: 64 MiB per TensorCore
        return 128 << 20               # v5e / v6e physical VMEM
    except Exception:
        return 64 << 20                # conservative


def _num_tensorcores():
    """TensorCores sharing the grid via dimension_semantics ('megacore' style)."""
    try:
        kind = jax.devices()[0].device_kind.lower()
        if any(t in kind for t in ("v4", "v5p", "v7", "7x")):
            return 2
    except Exception:
        pass
    return 1


def _vmem_footprint_bytes(tb, d_in_p, hid_p, cls_p, itemsize, x_bufs, w_bufs):
    x_bytes = x_bufs * tb * d_in_p * itemsize          # streaming activations
    lab_bytes = 2 * tb * 128 * 4                       # (tb,1) pads to 128 lanes
    w_bytes = w_bufs * (d_in_p * hid_p + hid_p * cls_p) * itemsize
    bias_bytes = w_bufs * 8 * (hid_p + cls_p) * 4      # (1,·) pads to 8 sublanes
    out_bytes = 2 * 8 * 128 * 4                        # (1,8,128) partial block
    inter = tb * hid_p * (4 + itemsize)                # h (f32) + MXU-dtype cast
    inter += 3 * tb * cls_p * 4                        # logits / exp / select temps
    return x_bytes + lab_bytes + w_bytes + bias_bytes + out_bytes + inter


def _make_kernel(tile_b, batch):
    def kernel(x_ref, w1_ref, b1_ref, w2_ref, b2_ref, lab_ref, part_ref):
        # x: (TILE_B, Din_p)  w1: (Din_p, H_p)  b1: (1, H_p)
        # w2: (H_p, C_p)      b2: (1, C_p)      lab: (TILE_B, 1) int32
        i = pl.program_id(0)

        # ---- Linear 1 + ReLU (MXU in operand dtype, f32 accumulate) ----
        h = jnp.dot(x_ref[...], w1_ref[...], preferred_element_type=jnp.float32)
        h = jnp.maximum(h + b1_ref[...], 0.0)

        # ---- Linear 2 (logits; padded class columns carry a -1e30 bias) ----
        logits = jnp.dot(h.astype(w2_ref.dtype), w2_ref[...],
                         preferred_element_type=jnp.float32) + b2_ref[...]

        # ---- Cross-entropy tail in f32 (EUP exp / XLU reductions) ----
        # TODO(synk): for very large class counts, chunk this over class blocks
        # with an online max/sum logsumexp instead of materializing (tb, C_p).
        m = jnp.max(logits, axis=-1, keepdims=True)                        # (T,1)
        lse = m + jnp.log(jnp.sum(jnp.exp(logits - m), axis=-1, keepdims=True))

        cls = jax.lax.broadcasted_iota(jnp.int32, logits.shape, 1)         # (T,C_p)
        picked = jnp.sum(jnp.where(cls == lab_ref[...], logits, 0.0),
                         axis=-1, keepdims=True)                           # (T,1)

        per_row = lse - picked                                             # (T,1)
        # Mask padded batch rows so they contribute 0 to the loss sum.
        row = i * tile_b + jax.lax.broadcasted_iota(jnp.int32, per_row.shape, 0)
        per_row = jnp.where(row < batch, per_row, 0.0)

        # Per-tile partial sum, written lane/sublane-dense (unmasked vst).
        part_ref[...] = jnp.broadcast_to(jnp.sum(per_row), part_ref.shape)

    return kernel


def mlp_cross_entropy(x, w1, b1, w2, b2, labels, *, tile_b=256,
                      mxu_dtype=jnp.bfloat16):
    """Fused MLP forward + mean cross-entropy loss (scalar)."""
    B, d_in = x.shape
    hidden = w1.shape[1]
    n_cls = w2.shape[1]

    # Lane-dense feature dims.
    d_in_p = _round_up(d_in, 128)
    hid_p = _round_up(hidden, 128)
    cls_p = _round_up(n_cls, 128)

    itemsize = jnp.dtype(mxu_dtype).itemsize
    # bf16 packs 16 rows per vreg; f32 needs 8.  tile_b=256 (default) fills the
    # 256-row MXU passes on v6e/v7x when the batch and VMEM budget allow.
    row_align = 16 if itemsize < 4 else 8

    vmem_cap = _vmem_capacity_bytes()
    budget = int(vmem_cap * 0.75)          # headroom for compiler scratch

    tb = min(_round_up(B, row_align), _round_up(tile_b, row_align))
    while (tb > row_align and
           _vmem_footprint_bytes(tb, d_in_p, hid_p, cls_p, itemsize, 3, 1) > budget):
        tb = max(row_align, _round_up(tb // 2, row_align))
    # TODO(synk): if (d_in_p*hid_p + hid_p*cls_p)*itemsize alone approaches the
    # per-core budget (each v7x TensorCore holds its own weight copy), add a
    # hidden/class grid axis ("arbitrary") with a VMEM f32 accumulator instead
    # of keeping both weight matrices resident; not needed at these sizes.

    b_p = _round_up(B, tb)
    n_tiles = b_p // tb

    # On 2-TensorCore parts, keep the "parallel" grid axis load-balanced.
    if _num_tensorcores() > 1 and n_tiles % 2 == 1:
        tb_half = _round_up(max(tb // 2, row_align), row_align)
        if tb_half < tb:
            tb = tb_half
            b_p = _round_up(B, tb)
            n_tiles = b_p // tb

    # Deepen the x stream when per-row arithmetic intensity is low (mem-bound).
    flops_per_x_byte = 2.0 * (d_in_p * hid_p + hid_p * cls_p) / (d_in_p * itemsize)
    x_bufs = 3 if (n_tiles >= 4 and flops_per_x_byte < 300.0) else 2

    footprint = _vmem_footprint_bytes(tb, d_in_p, hid_p, cls_p, itemsize, x_bufs, 1)
    vmem_limit = int(min(vmem_cap, max(32 << 20, footprint + (8 << 20))))

    # Pad operands (exact: zero pads contribute nothing; -1e30 bias on pad classes).
    xp = _pad_to(_pad_to(x.astype(jnp.float32), 1, d_in_p), 0, b_p).astype(mxu_dtype)
    w1p = _pad_to(_pad_to(w1.astype(jnp.float32), 0, d_in_p), 1, hid_p).astype(mxu_dtype)
    b1p = _pad_to(b1.astype(jnp.float32), 0, hid_p).reshape(1, hid_p)
    w2p = _pad_to(_pad_to(w2.astype(jnp.float32), 0, hid_p), 1, cls_p).astype(mxu_dtype)
    b2p = _pad_to(b2.astype(jnp.float32), 0, cls_p, value=_NEG_BIG).reshape(1, cls_p)
    labp = _pad_to(labels.astype(jnp.int32), 0, b_p).reshape(b_p, 1)

    flops = 2 * b_p * (d_in_p * hid_p + hid_p * cls_p)
    bytes_accessed = (
        xp.size * xp.dtype.itemsize + w1p.size * w1p.dtype.itemsize
        + w2p.size * w2p.dtype.itemsize + b1p.size * 4 + b2p.size * 4
        + labp.size * 4 + n_tiles * 8 * 128 * 4)
    cost = pl.CostEstimate(flops=flops, transcendentals=b_p * cls_p,
                           bytes_accessed=bytes_accessed)

    kernel = _make_kernel(tb, B)
    out_shape = jax.ShapeDtypeStruct((n_tiles, 8, 128), jnp.float32)
    compiler_params = pltpu.CompilerParams(
        dimension_semantics=("parallel",),   # megacore / v7x 2-TC sharding
        vmem_limit_bytes=vmem_limit)

    def call(tuned):
        x_kw, w_kw = {}, {}
        if tuned:
            # Constant index_map -> a second buffer is pure waste.
            w_kw = dict(pipeline_mode=pl.Buffered(1))
            if x_bufs != 2:
                x_kw = dict(pipeline_mode=pl.Buffered(x_bufs))
        grid_spec = pltpu.PrefetchScalarGridSpec(
            num_scalar_prefetch=0,
            grid=(n_tiles,),
            in_specs=[
                pl.BlockSpec((tb, d_in_p), lambda i: (i, 0), **x_kw),      # x tile
                pl.BlockSpec((d_in_p, hid_p), lambda i: (0, 0), **w_kw),   # w1
                pl.BlockSpec((1, hid_p), lambda i: (0, 0), **w_kw),        # b1
                pl.BlockSpec((hid_p, cls_p), lambda i: (0, 0), **w_kw),    # w2
                pl.BlockSpec((1, cls_p), lambda i: (0, 0), **w_kw),        # b2
                pl.BlockSpec((tb, 1), lambda i: (i, 0)),                   # labels
            ],
            # One (8,128)-dense partial-loss block per batch tile.
            out_specs=pl.BlockSpec((1, 8, 128), lambda i: (i, 0, 0)))
        return pl.pallas_call(
            kernel, grid_spec=grid_spec, out_shape=out_shape,
            compiler_params=compiler_params, cost_estimate=cost,
        )(xp, w1p, b1p, w2p, b2p, labp)

    try:
        partials = call(True)
    except Exception:
        # pipeline_mode not supported by this Pallas build: fall back to the
        # default double-buffered specs (identical semantics).
        partials = call(False)

    # Tiny cross-tile reduction + mean outside the kernel.
    return jnp.sum(partials[:, 0, 0]) / B


def init_params(key, input_dim, hidden_dim, output_dim):
    # Deterministic init mimicking nn.Linear's uniform(-1/sqrt(fan_in), 1/sqrt(fan_in)).
    k1, k2, k3, k4 = jax.random.split(key, 4)
    lim1 = 1.0 / (input_dim ** 0.5)
    lim2 = 1.0 / (hidden_dim ** 0.5)
    w1 = jax.random.uniform(k1, (input_dim, hidden_dim), jnp.float32, -lim1, lim1)
    b1 = jax.random.uniform(k2, (hidden_dim,), jnp.float32, -lim1, lim1)
    w2 = jax.random.uniform(k3, (hidden_dim, output_dim), jnp.float32, -lim2, lim2)
    b2 = jax.random.uniform(k4, (output_dim,), jnp.float32, -lim2, lim2)
    return w1, b1, w2, b2


if __name__ == "__main__":
    B, INPUT_DIM, HIDDEN_DIM, OUTPUT_DIM = 8, 32, 32, 10

    key = jax.random.PRNGKey(0)
    kx, kl, kp = jax.random.split(key, 3)
    x = jax.random.normal(kx, (B, INPUT_DIM), dtype=jnp.float32)
    labels = jax.random.randint(kl, (B,), 0, OUTPUT_DIM, dtype=jnp.int32)
    w1, b1, w2, b2 = init_params(kp, INPUT_DIM, HIDDEN_DIM, OUTPUT_DIM)

    # ---- default path: bf16 MXU operands, f32 accumulation / f32 CE tail ----
    loss_bf16 = mlp_cross_entropy(x, w1, b1, w2, b2, labels)
    jax.block_until_ready(loss_bf16)

    xb, w1b, w2b = (x.astype(jnp.bfloat16), w1.astype(jnp.bfloat16),
                    w2.astype(jnp.bfloat16))
    hb = jnp.maximum(jnp.dot(xb, w1b, preferred_element_type=jnp.float32) + b1, 0.0)
    lgb = jnp.dot(hb.astype(jnp.bfloat16), w2b,
                  preferred_element_type=jnp.float32) + b2
    ref_bf16 = jnp.mean(
        jax.nn.logsumexp(lgb, axis=-1)
        - jnp.take_along_axis(lgb, labels[:, None], axis=-1)[:, 0])
    assert jnp.allclose(loss_bf16, ref_bf16, atol=5e-3, rtol=5e-3), (loss_bf16, ref_bf16)

    # ---- full-f32 MXU path (fidelity check; default MXU precision as before) ----
    loss_f32 = mlp_cross_entropy(x, w1, b1, w2, b2, labels, mxu_dtype=jnp.float32)
    jax.block_until_ready(loss_f32)

    h_ref = jnp.maximum(x @ w1 + b1, 0.0)
    logits_ref = h_ref @ w2 + b2
    ref_f32 = jnp.mean(
        jax.nn.logsumexp(logits_ref, axis=-1)
        - jnp.take_along_axis(logits_ref, labels[:, None], axis=-1)[:, 0])
    assert jnp.allclose(loss_f32, ref_f32, atol=2e-5, rtol=2e-5), (loss_f32, ref_f32)

    print("KERNEL_OK")
</pallas_src>

<mosaic_0001>
module attributes {stable_mosaic.version = 11 : i64} {
  func.func @kernel(%arg0: i32, %arg1: memref<16x128xbf16, #tpu.memory_space<vmem>>, %arg2: memref<128x128xbf16, #tpu.memory_space<vmem>>, %arg3: memref<1x128xf32, #tpu.memory_space<vmem>>, %arg4: memref<128x128xbf16, #tpu.memory_space<vmem>>, %arg5: memref<1x128xf32, #tpu.memory_space<vmem>>, %arg6: memref<16x1xi32, #tpu.memory_space<vmem>>, %arg7: memref<1x8x128xf32, #tpu.memory_space<vmem>>) attributes {dimension_semantics = [#tpu.dimension_semantics<parallel>], iteration_bounds = array<i64: 1>, scalar_prefetch = 0 : i64, scratch_operands = 0 : i64, tpu.core_type = #tpu.core_type<tc>, window_params = [{transform_indices = @transform_0, window_bounds = array<i64: 16, 128>}, {pipeline_mode = #tpu.pipeline_mode<synchronous>, transform_indices = @transform_1, window_bounds = array<i64: 128, 128>}, {pipeline_mode = #tpu.pipeline_mode<synchronous>, transform_indices = @transform_2, window_bounds = array<i64: 1, 128>}, {pipeline_mode = #tpu.pipeline_mode<synchronous>, transform_indices = @transform_3, window_bounds = array<i64: 128, 128>}, {pipeline_mode = #tpu.pipeline_mode<synchronous>, transform_indices = @transform_4, window_bounds = array<i64: 1, 128>}, {transform_indices = @transform_5, window_bounds = array<i64: 16, 1>}, {transform_indices = @transform_6, window_bounds = array<i64: 1, 8, 128>}]} {
    %c0 = arith.constant 0 : index
    %c0_0 = arith.constant 0 : index
    %0 = vector.load %arg1[%c0, %c0_0] : memref<16x128xbf16, #tpu.memory_space<vmem>>, vector<16x128xbf16>
    %c0_1 = arith.constant 0 : index
    %c0_2 = arith.constant 0 : index
    %1 = vector.load %arg2[%c0_1, %c0_2] : memref<128x128xbf16, #tpu.memory_space<vmem>>, vector<128x128xbf16>
    %cst = arith.constant dense<0.000000e+00> : vector<16x128xf32>
    %2 = tpu.matmul %0, %1, %cst {dimension_numbers = #tpu.dot_dimension_numbers<[1], [0], [0], [1], [0, 0, 1, 1], [], []>} : vector<16x128xbf16>, vector<128x128xbf16>, vector<16x128xf32> -> vector<16x128xf32>
    %c0_3 = arith.constant 0 : index
    %c0_4 = arith.constant 0 : index
    %3 = vector.load %arg3[%c0_3, %c0_4] : memref<1x128xf32, #tpu.memory_space<vmem>>, vector<1x128xf32>
    %4 = vector.broadcast %3 : vector<1x128xf32> to vector<16x128xf32>
    %5 = arith.addf %2, %4 : vector<16x128xf32>
    %cst_5 = arith.constant 0.000000e+00 : f32
    %6 = vector.broadcast %cst_5 : f32 to vector<16x128xf32>
    %7 = arith.maximumf %5, %6 : vector<16x128xf32>
    %8 = arith.truncf %7 : vector<16x128xf32> to vector<16x128xbf16>
    %c0_6 = arith.constant 0 : index
    %c0_7 = arith.constant 0 : index
    %9 = vector.load %arg4[%c0_6, %c0_7] : memref<128x128xbf16, #tpu.memory_space<vmem>>, vector<128x128xbf16>
    %cst_8 = arith.constant dense<0.000000e+00> : vector<16x128xf32>
    %10 = tpu.matmul %8, %9, %cst_8 {dimension_numbers = #tpu.dot_dimension_numbers<[1], [0], [0], [1], [0, 0, 1, 1], [], []>} : vector<16x128xbf16>, vector<128x128xbf16>, vector<16x128xf32> -> vector<16x128xf32>
    %c0_9 = arith.constant 0 : index
    %c0_10 = arith.constant 0 : index
    %11 = vector.load %arg5[%c0_9, %c0_10] : memref<1x128xf32, #tpu.memory_space<vmem>>, vector<1x128xf32>
    %12 = vector.broadcast %11 : vector<1x128xf32> to vector<16x128xf32>
    %13 = arith.addf %10, %12 : vector<16x128xf32>
    %cst_11 = arith.constant dense<0xFF800000> : vector<16xf32>
    %14 = vector.multi_reduction <maximumf>, %13, %cst_11 [1] : vector<16x128xf32> to vector<16xf32>
    %15 = vector.shape_cast %14 : vector<16xf32> to vector<16x1xf32>
    %16 = vector.broadcast %15 : vector<16x1xf32> to vector<16x128xf32>
    %17 = arith.subf %13, %16 : vector<16x128xf32>
    %18 = math.exp %17 : vector<16x128xf32>
    %cst_12 = arith.constant dense<0.000000e+00> : vector<16xf32>
    %19 = vector.multi_reduction <add>, %18, %cst_12 [1] : vector<16x128xf32> to vector<16xf32>
    %20 = vector.shape_cast %19 : vector<16xf32> to vector<16x1xf32>
    %21 = math.log %20 : vector<16x1xf32>
    %22 = arith.addf %15, %21 : vector<16x1xf32>
    %23 = tpu.iota {dimensions = array<i32: 1>} : vector<16x128xi32>
    %c0_13 = arith.constant 0 : index
    %c0_14 = arith.constant 0 : index
    %24 = vector.load %arg6[%c0_13, %c0_14] : memref<16x1xi32, #tpu.memory_space<vmem>>, vector<16x1xi32>
    %25 = vector.broadcast %24 : vector<16x1xi32> to vector<16x128xi32>
    %26 = arith.cmpi eq, %23, %25 : vector<16x128xi32>
    %cst_15 = arith.constant 0.000000e+00 : f32
    %27 = vector.broadcast %cst_15 : f32 to vector<16x128xf32>
    %28 = arith.select %26, %13, %27 : vector<16x128xi1>, vector<16x128xf32>
    %cst_16 = arith.constant dense<0.000000e+00> : vector<16xf32>
    %29 = vector.multi_reduction <add>, %28, %cst_16 [1] : vector<16x128xf32> to vector<16xf32>
    %30 = vector.shape_cast %29 : vector<16xf32> to vector<16x1xf32>
    %31 = arith.subf %22, %30 : vector<16x1xf32>
    %c16_i32 = arith.constant 16 : i32
    %32 = arith.muli %arg0, %c16_i32 : i32
    %33 = tpu.iota {dimensions = array<i32: 0>} : vector<16x1xi32>
    %34 = vector.broadcast %32 : i32 to vector<16x1xi32>
    %35 = arith.addi %34, %33 : vector<16x1xi32>
    %c8_i32 = arith.constant 8 : i32
    %36 = vector.broadcast %c8_i32 : i32 to vector<16x1xi32>
    %37 = arith.cmpi slt, %35, %36 : vector<16x1xi32>
    %cst_17 = arith.constant 0.000000e+00 : f32
    %38 = vector.broadcast %cst_17 : f32 to vector<16x1xf32>
    %39 = arith.select %37, %31, %38 : vector<16x1xi1>, vector<16x1xf32>
    %40 = vector.shape_cast %39 : vector<16x1xf32> to vector<1x16x1xf32>
    %cst_18 = arith.constant dense<0.000000e+00> : vector<1xf32>
    %41 = vector.multi_reduction <add>, %40, %cst_18 [1, 2] : vector<1x16x1xf32> to vector<1xf32>
    %42 = vector.shape_cast %41 : vector<1xf32> to vector<1x1x1xf32>
    %43 = vector.extract %42[0, 0, 0] : f32 from vector<1x1x1xf32>
    %44 = vector.broadcast %43 : f32 to vector<1x8x128xf32>
    %c0_19 = arith.constant 0 : index
    %c0_20 = arith.constant 0 : index
    %c0_21 = arith.constant 0 : index
    %45 = vector.load %arg7[%c0_19, %c0_20, %c0_21] : memref<1x8x128xf32, #tpu.memory_space<vmem>>, vector<1x8x128xf32>
    tpu.vector_store %arg7[%c0_19, %c0_20, %c0_21], %44 {strides = array<i32>} : memref<1x8x128xf32, #tpu.memory_space<vmem>>, vector<1x8x128xf32>,
    return
  }
  func.func @transform_0(%arg0: i32) -> (i32, i32) {
    %c0_i32 = arith.constant 0 : i32
    %c0_i32_0 = arith.constant 0 : i32
    return %arg0, %c0_i32 : i32, i32
  }
  func.func @transform_1(%arg0: i32) -> (i32, i32) {
    %c0_i32 = arith.constant 0 : i32
    %c0_i32_0 = arith.constant 0 : i32
    %c0_i32_1 = arith.constant 0 : i32
    return %c0_i32, %c0_i32_0 : i32, i32
  }
  func.func @transform_2(%arg0: i32) -> (i32, i32) {
    %c0_i32 = arith.constant 0 : i32
    %c0_i32_0 = arith.constant 0 : i32
    %c0_i32_1 = arith.constant 0 : i32
    return %c0_i32, %c0_i32_0 : i32, i32
  }
  func.func @transform_3(%arg0: i32) -> (i32, i32) {
    %c0_i32 = arith.constant 0 : i32
    %c0_i32_0 = arith.constant 0 : i32
    %c0_i32_1 = arith.constant 0 : i32
    return %c0_i32, %c0_i32_0 : i32, i32
  }
  func.func @transform_4(%arg0: i32) -> (i32, i32) {
    %c0_i32 = arith.constant 0 : i32
    %c0_i32_0 = arith.constant 0 : i32
    %c0_i32_1 = arith.constant 0 : i32
    return %c0_i32, %c0_i32_0 : i32, i32
  }
  func.func @transform_5(%arg0: i32) -> (i32, i32) {
    %c0_i32 = arith.constant 0 : i32
    %c0_i32_0 = arith.constant 0 : i32
    return %arg0, %c0_i32 : i32, i32
  }
  func.func @transform_6(%arg0: i32) -> (i32, i32, i32) {
    %c0_i32 = arith.constant 0 : i32
    %c0_i32_0 = arith.constant 0 : i32
    %c0_i32_1 = arith.constant 0 : i32
    return %arg0, %c0_i32, %c0_i32_0 : i32, i32, i32
  }
}

module attributes {stable_mosaic.version = 11 : i64} {
  func.func @kernel(%arg0: i32, %arg1: memref<16x128xbf16, #tpu.memory_space<vmem>>, %arg2: memref<128x128xbf16, #tpu.memory_space<vmem>>, %arg3: memref<1x128xf32, #tpu.memory_space<vmem>>, %arg4: memref<128x128xbf16, #tpu.memory_space<vmem>>, %arg5: memref<1x128xf32, #tpu.memory_space<vmem>>, %arg6: memref<16x1xi32, #tpu.memory_space<vmem>>, %arg7: memref<1x8x128xf32, #tpu.memory_space<vmem>>) attributes {dimension_semantics = [#tpu.dimension_semantics<parallel>], iteration_bounds = array<i64: 1>, scalar_prefetch = 0 : i64, scratch_operands = 0 : i64, tpu.core_type = #tpu.core_type<tc>, window_params = [{transform_indices = @transform_0, window_bounds = array<i64: 16, 128>}, {pipeline_mode = #tpu.pipeline_mode<synchronous>, transform_indices = @transform_1, window_bounds = array<i64: 128, 128>}, {pipeline_mode = #tpu.pipeline_mode<synchronous>, transform_indices = @transform_2, window_bounds = array<i64: 1, 128>}, {pipeline_mode = #tpu.pipeline_mode<synchronous>, transform_indices = @transform_3, window_bounds = array<i64: 128, 128>}, {pipeline_mode = #tpu.pipeline_mode<synchronous>, transform_indices = @transform_4, window_bounds = array<i64: 1, 128>}, {transform_indices = @transform_5, window_bounds = array<i64: 16, 1>}, {transform_indices = @transform_6, window_bounds = array<i64: 1, 8, 128>}]} {
    %c0 = arith.constant 0 : index
    %c0_0 = arith.constant 0 : index
    %0 = vector.load %arg1[%c0, %c0_0] : memref<16x128xbf16, #tpu.memory_space<vmem>>, vector<16x128xbf16>
    %c0_1 = arith.constant 0 : index
    %c0_2 = arith.constant 0 : index
    %1 = vector.load %arg2[%c0_1, %c0_2] : memref<128x128xbf16, #tpu.memory_space<vmem>>, vector<128x128xbf16>
    %cst = arith.constant dense<0.000000e+00> : vector<16x128xf32>
    %2 = tpu.matmul %0, %1, %cst {dimension_numbers = #tpu.dot_dimension_numbers<[1], [0], [0], [1], [0, 0, 1, 1], [], []>} : vector<16x128xbf16>, vector<128x128xbf16>, vector<16x128xf32> -> vector<16x128xf32>
    %c0_3 = arith.constant 0 : index
    %c0_4 = arith.constant 0 : index
    %3 = vector.load %arg3[%c0_3, %c0_4] : memref<1x128xf32, #tpu.memory_space<vmem>>, vector<1x128xf32>
    %4 = vector.broadcast %3 : vector<1x128xf32> to vector<16x128xf32>
    %5 = arith.addf %2, %4 : vector<16x128xf32>
    %cst_5 = arith.constant 0.000000e+00 : f32
    %6 = vector.broadcast %cst_5 : f32 to vector<16x128xf32>
    %7 = arith.maximumf %5, %6 : vector<16x128xf32>
    %8 = arith.truncf %7 : vector<16x128xf32> to vector<16x128xbf16>
    %c0_6 = arith.constant 0 : index
    %c0_7 = arith.constant 0 : index
    %9 = vector.load %arg4[%c0_6, %c0_7] : memref<128x128xbf16, #tpu.memory_space<vmem>>, vector<128x128xbf16>
    %cst_8 = arith.constant dense<0.000000e+00> : vector<16x128xf32>
    %10 = tpu.matmul %8, %9, %cst_8 {dimension_numbers = #tpu.dot_dimension_numbers<[1], [0], [0], [1], [0, 0, 1, 1], [], []>} : vector<16x128xbf16>, vector<128x128xbf16>, vector<16x128xf32> -> vector<16x128xf32>
    %c0_9 = arith.constant 0 : index
    %c0_10 = arith.constant 0 : index
    %11 = vector.load %arg5[%c0_9, %c0_10] : memref<1x128xf32, #tpu.memory_space<vmem>>, vector<1x128xf32>
    %12 = vector.broadcast %11 : vector<1x128xf32> to vector<16x128xf32>
    %13 = arith.addf %10, %12 : vector<16x128xf32>
    %cst_11 = arith.constant dense<0xFF800000> : vector<16xf32>
    %14 = vector.multi_reduction <maximumf>, %13, %cst_11 [1] : vector<16x128xf32> to vector<16xf32>
    %15 = vector.shape_cast %14 : vector<16xf32> to vector<16x1xf32>
    %16 = vector.broadcast %15 : vector<16x1xf32> to vector<16x128xf32>
    %17 = arith.subf %13, %16 : vector<16x128xf32>
    %18 = math.exp %17 : vector<16x128xf32>
    %cst_12 = arith.constant dense<0.000000e+00> : vector<16xf32>
    %19 = vector.multi_reduction <add>, %18, %cst_12 [1] : vector<16x128xf32> to vector<16xf32>
    %20 = vector.shape_cast %19 : vector<16xf32> to vector<16x1xf32>
    %21 = math.log %20 : vector<16x1xf32>
    %22 = arith.addf %15, %21 : vector<16x1xf32>
    %23 = tpu.iota {dimensions = array<i32: 1>} : vector<16x128xi32>
    %c0_13 = arith.constant 0 : index
    %c0_14 = arith.constant 0 : index
    %24 = vector.load %arg6[%c0_13, %c0_14] : memref<16x1xi32, #tpu.memory_space<vmem>>, vector<16x1xi32>
    %25 = vector.broadcast %24 : vector<16x1xi32> to vector<16x128xi32>
    %26 = arith.cmpi eq, %23, %25 : vector<16x128xi32>
    %cst_15 = arith.constant 0.000000e+00 : f32
    %27 = vector.broadcast %cst_15 : f32 to vector<16x128xf32>
    %28 = arith.select %26, %13, %27 : vector<16x128xi1>, vector<16x128xf32>
    %cst_16 = arith.constant dense<0.000000e+00> : vector<16xf32>
    %29 = vector.multi_reduction <add>, %28, %cst_16 [1] : vector<16x128xf32> to vector<16xf32>
    %30 = vector.shape_cast %29 : vector<16xf32> to vector<16x1xf32>
    %31 = arith.subf %22, %30 : vector<16x1xf32>
    %c16_i32 = arith.constant 16 : i32
    %32 = arith.muli %arg0, %c16_i32 : i32
    %33 = tpu.iota {dimensions = array<i32: 0>} : vector<16x1xi32>
    %34 = vector.broadcast %32 : i32 to vector<16x1xi32>
    %35 = arith.addi %34, %33 : vector<16x1xi32>
    %c8_i32 = arith.constant 8 : i32
    %36 = vector.broadcast %c8_i32 : i32 to vector<16x1xi32>
    %37 = arith.cmpi slt, %35, %36 : vector<16x1xi32>
    %cst_17 = arith.constant 0.000000e+00 : f32
    %38 = vector.broadcast %cst_17 : f32 to vector<16x1xf32>
    %39 = arith.select %37, %31, %38 : vector<16x1xi1>, vector<16x1xf32>
    %40 = vector.shape_cast %39 : vector<16x1xf32> to vector<1x16x1xf32>
    %cst_18 = arith.constant dense<0.000000e+00> : vector<1xf32>
    %41 = vector.multi_reduction <add>, %40, %cst_18 [1, 2] : vector<1x16x1xf32> to vector<1xf32>
    %42 = vector.shape_cast %41 : vector<1xf32> to vector<1x1x1xf32>
    %43 = vector.extract %42[0, 0, 0] : f32 from vector<1x1x1xf32>
    %44 = vector.broadcast %43 : f32 to vector<1x8x128xf32>
    %c0_19 = arith.constant 0 : index
    %c0_20 = arith.constant 0 : index
    %c0_21 = arith.constant 0 : index
    %45 = vector.load %arg7[%c0_19, %c0_20, %c0_21] : memref<1x8x128xf32, #tpu.memory_space<vmem>>, vector<1x8x128xf32>
    tpu.vector_store %arg7[%c0_19, %c0_20, %c0_21], %44 {strides = array<i32>} : memref<1x8x128xf32, #tpu.memory_space<vmem>>, vector<1x8x128xf32>,
    return
  }
  func.func @transform_0(%arg0: i32) -> (i32, i32) {
    %c0_i32 = arith.constant 0 : i32
    %c0_i32_0 = arith.constant 0 : i32
    return %arg0, %c0_i32 : i32, i32
  }
  func.func @transform_1(%arg0: i32) -> (i32, i32) {
    %c0_i32 = arith.constant 0 : i32
    %c0_i32_0 = arith.constant 0 : i32
    %c0_i32_1 = arith.constant 0 : i32
    return %c0_i32, %c0_i32_0 : i32, i32
  }
  func.func @transform_2(%arg0: i32) -> (i32, i32) {
    %c0_i32 = arith.constant 0 : i32
    %c0_i32_0 = arith.constant 0 : i32
    %c0_i32_1 = arith.constant 0 : i32
    return %c0_i32, %c0_i32_0 : i32, i32
  }
  func.func @transform_3(%arg0: i32) -> (i32, i32) {
    %c0_i32 = arith.constant 0 : i32
    %c0_i32_0 = arith.constant 0 : i32
    %c0_i32_1 = arith.constant 0 : i32
    return %c0_i32, %c0_i32_0 : i32, i32
  }
  func.func @transform_4(%arg0: i32) -> (i32, i32) {
    %c0_i32 = arith.constant 0 : i32
    %c0_i32_0 = arith.constant 0 : i32
    %c0_i32_1 = arith.constant 0 : i32
    return %c0_i32, %c0_i32_0 : i32, i32
  }
  func.func @transform_5(%arg0: i32) -> (i32, i32) {
    %c0_i32 = arith.constant 0 : i32
    %c0_i32_0 = arith.constant 0 : i32
    return %arg0, %c0_i32 : i32, i32
  }
  func.func @transform_6(%arg0: i32) -> (i32, i32, i32) {
    %c0_i32 = arith.constant 0 : i32
    %c0_i32_0 = arith.constant 0 : i32
    %c0_i32_1 = arith.constant 0 : i32
    return %arg0, %c0_i32, %c0_i32_0 : i32, i32, i32
  }
}

</mosaic_0001>

<bundles_post_ra>
// kernel: tpu_custom_call.1
= control target key start
LH: loop header
LB: loop body
LE: loop exit
PB: predicated region body
PF: predicated region fallthrough
CT: control target
= control target key end

     0   :  { %11 = vsyncpa [#allocation3], 0  ;;  %s555_s0 = inlined_call_operand.vmem [shape: bf16[16,128], index: 0, kind: input, shape index: {}]   ;;  %s556_s1 = inlined_call_operand.hbm [shape: bf16[128,128], index: 1, kind: input, shape index: {}]   ;;  %s557_s2 = inlined_call_operand.vmem [shape: f32[1,128], index: 2, kind: input, shape index: {}]   ;;  %s558_s3 = inlined_call_operand.hbm [shape: bf16[128,128], index: 3, kind: input, shape index: {}]   ;;  %s559_s4 = inlined_call_operand.vmem [shape: f32[1,128], index: 4, kind: input, shape index: {}]   ;;  %s560_s5 = inlined_call_operand.vmem [shape: s32[16,1], index: 5, kind: input, shape index: {}]   ;;  %s561_s6 = inlined_call_operand.hbm [shape: f32[1,8,128], index: 6, kind: output, shape index: {}]  }
   0x1   :  { %12 = vsyncpa [#allocation6], 0 }
   0x2   :  { %13 = vsyncpa [#allocation4], 0  ;;  %s20_s23 = sshll.u32 %s556_s1, 4  ;;  %s493_s24 = smov [#allocation2]   ;;  %s21_s23 = int_to_ptr.hbm [resolvable:$true] %s20_s23 }
   0x3   :  { %s22_s25 = sshll.u32 %s493_s24, 4  ;;  %s35_s28 = sshll.u32 %s558_s3, 4  ;;  %s23_s25 = int_to_ptr.vmem [resolvable:$true] %s22_s25  ;;  %s36_s28 = int_to_ptr.hbm [resolvable:$true] %s35_s28 }
   0x4   :  { %s494_s29 = smov 64   ;;  %s495_s30 = smov 4  }
   0x5   :  { %28 = dma.hbm_to_vmem [thread:$0]  %s21_s23, 1024, %s23_s25, [#allocation3], %s494_s29, %s494_s29, %s495_s30  }
   0x6   :  { %s496_s7 = smov [#allocation5]  }
   0x7   :  { %s37_s8 = sshll.u32 %s496_s7, 4  ;;  %s38_s8 = int_to_ptr.vmem [resolvable:$true] %s37_s8 }
   0x8   :  { %43 = dma.hbm_to_vmem [thread:$0]  %s36_s28, 1024, %s38_s8, [#allocation6], %s494_s29, %s494_s29, %s495_s30  }
   0x9   :  { %487 = dma.done.wait [#allocation3], 1024  }
   0xa   :  { %488 = vsyncadd [#allocation3], 4294966272 }
   0xb   :  { %489 = dma.done.wait [#allocation6], 1024  }
   0xc   :  { %490 = vsyncadd [#allocation6], 4294966272  ;;  %v391_v0 = vld [vmem:[#allocation2 + $0x38] sm:$0xff]  ;;  %v390_v1 = vld [vmem:[#allocation2 + $0x30] sm:$0xff]  ;;  %v497_v25 = vmov 0   ;;  %v251_v35 = vlaneseq  ;;  %vm282_vm1 = vcmask 7168  }
   0xd   :  { %132 = vmatpush.bf16.msra.mxu0 %v391_v0  ;;  %v399_v2 = vld [vmem:[#allocation5 + $0x38] sm:$0xff]  ;;  %v398_v3 = vld [vmem:[#allocation5 + $0x30] sm:$0xff]  ;;  %v389_v4 = vld [vmem:[#allocation2 + $0x28] sm:$0xff]  ;;  %408 = vset.pattern.permute.xlu0 %v497_v25  ;;  %s304_s15 = sshll.u32 %s561_s6, 4  ;;  %s305_s15 = int_to_ptr.hbm [resolvable:$true] %s304_s15 }
   0xe   :  { %217 = vmatpush.bf16.msra.mxu1 %v399_v2  ;;  %v397_v5 = vld [vmem:[#allocation5 + $0x28] sm:$0xff]  ;;  %v388_v6 = vld [vmem:[#allocation2 + $0x20] sm:$0xff]  ;;  %v387_v8 = vld [vmem:[#allocation2 + $0x18] sm:$0xff]  ;;  %v252_v36 = vand.u32 127, %v251_v35 }
   0xf   :  { %v396_v7 = vld [vmem:[#allocation5 + $0x20] sm:$0xff]  ;;  %v386_v9 = vld [vmem:[#allocation2 + $0x10] sm:$0xff]  ;;  %v385_v10 = vld [vmem:[#allocation2 + $0x8] sm:$0xff] }
  0x10   :  { %v384_v11 = vld [vmem:[#allocation2] sm:$0xff]  ;;  %v395_v13 = vld [vmem:[#allocation5 + $0x18] sm:$0xff]  ;;  %v394_v14 = vld [vmem:[#allocation5 + $0x10] sm:$0xff] }
  0x11   :  { %133 = vmatpush.bf16.msra.mxu0 %v390_v1  ;;  %v383_v12 = vld [vmem:[%s555_s0] sm:$0xff]  ;;  %v393_v15 = vld [vmem:[#allocation5 + $0x8] sm:$0xff] }
  0x12   :  { %218 = vmatpush.bf16.msra.mxu1 %v398_v3  ;;  %v392_v16 = vld [vmem:[#allocation5] sm:$0xff] }
  0x13   :  { %v409_v18 = vld [vmem:[%s557_s2] ss:$0 sm:$0xff]  ;;  %s498_s2 = smov [#allocation7]  }
  0x14   :  { %v410_v26 = vld [vmem:[%s559_s4] ss:$0 sm:$0xff]  ;;  %s302_s4 = sshll.u32 %s498_s2, 4  ;;  %s303_s4 = int_to_ptr.vmem [resolvable:$true] %s302_s4 }
  0x15   :  { %134 = vmatpush.bf16.msra.mxu0 %v389_v4  ;;  %v253_v30 = vld [vmem:[%s560_s5] sm:$0xff] }
  0x16   :  { %219 = vmatpush.bf16.msra.mxu1 %v397_v5 }
  0x19   :  { %135 = vmatpush.bf16.msra.mxu0 %v388_v6 }
  0x1a   :  { %220 = vmatpush.bf16.msra.mxu1 %v396_v7 }
  0x1d   :  { %136 = vmatpush.bf16.msra.mxu0 %v387_v8 }
  0x1e   :  { %221 = vmatpush.bf16.msra.mxu1 %v395_v13 }
  0x21   :  { %137 = vmatpush.bf16.msra.mxu0 %v386_v9 }
  0x22   :  { %222 = vmatpush.bf16.msra.mxu1 %v394_v14 }
  0x25   :  { %138 = vmatpush.bf16.msra.mxu0 %v385_v10 }
  0x26   :  { %223 = vmatpush.bf16.msra.mxu1 %v393_v15 }
  0x29   :  { %139 = vmatpush.bf16.msra.mxu0 %v384_v11 }
  0x2a   :  { %224 = vmatpush.bf16.msra.mxu1 %v392_v16 }
  0x2c   :  { %140 = vmatmul.bf16.vlgmr.msra.gmra.mxu0 %v383_v12 }
  0xa9   :  { %v141_v17 = vpop.f32.mrf.mxu0 }
  0xaa   :  { %v142_v19 = vadd.f32 %v409_v18, %v141_v17 }
  0xac   :  { %v146_v22 = vmax.f32 %v142_v19, 0.0 }
  0xb1   :  { %v143_v20 = vpop.f32.mrf.mxu0 }
  0xb2   :  { %v144_v21 = vadd.f32 %v409_v18, %v143_v20 }
  0xb4   :  { %v147_v23 = vmax.f32 %v144_v21, 0.0 }
  0xb6   :  { %v148_v24 = vpack.c.bf16 %v147_v23, %v146_v22 }
  0xb8   :  { %225 = vmatmul.bf16.vlgmr.msra.gmra.mxu1 %v148_v24 }
 0x135   :  { %v226_v27 = vpop.f32.mrf.mxu1 }
 0x136   :  { %v227_v28 = vadd.f32 %v410_v26, %v226_v27 }
 0x138   :  { %231 = vmax.xlane.f32.xlu0 %v227_v28 }
 0x13d   :  { %v228_v29 = vpop.f32.mrf.mxu1 }
 0x14c   :  { %256 = vperm.xlu0 %408, %v253_v30  }
 0x1ab   :  { %v232_v31 = vpop.xlane.xlu0 %231 }
 0x1ac   :  { %v235_v32 = vsub.f32 %v227_v28, %v232_v31 }
 0x1ae   :  { %v237_v33 = vmul.f32 1.442695, %v235_v32 }
 0x1b0   :  { %411 = vpow2.f32 %v237_v33 }
 0x1b6   :  { %v412_v34 = vpop.eup %411 }
 0x1b7   :  { %241 = vadd.xlane.f32.xlu1 %v412_v34 }
 0x1be   :  { %v257_v37 = vpop.permute.xlu0 %256 }
 0x1bf   :  { %vm261_vm0 = vcmp.eq.s32.totalorder %v252_v36, %v257_v37 }
 0x1c0   :  { %v263_v38 = vsel %vm261_vm0, %v227_v28, 0.0 }
 0x1c1   :  { %265 = vadd.xlane.f32.xlu1 %v263_v38 }
 0x22a   :  { %v242_v39 = vpop.xlane.xlu1 %241 }
 0x22b   :  { %413 = vlog2.f32 %v242_v39 }
 0x231   :  { %v414_v40 = vpop.eup %413 }
 0x232   :  { %v246_v41 = vmul.f32 0.6931472, %v414_v40 }
 0x234   :  { %v249_v42 = vadd.f32 %v246_v41, %v232_v31  ;;  %v266_v43 = vpop.xlane.xlu1 %265 }
 0x236   :  { %v269_v44 = vsub.f32 %v249_v42, %v266_v43 }
 0x238   :  { %v283_v45 = vsel %vm282_vm1, %v269_v44, 0.0 }
 0x239   :  { %286 = vadd.xlane.f32.xlu2 %v283_v45 }
 0x2ac   :  { %v287_v46 = vpop.xlane.xlu2 %286 }
 0x2ad   :  { %v288_v47 = vrot.slane %v287_v46, 4 }
 0x2af   :  { %v289_v48 = vadd.f32 %v288_v47, %v287_v46 }
 0x2b1   :  { %v290_v49 = vrot.slane %v289_v48, 2 }
 0x2b3   :  { %v291_v50 = vadd.f32 %v290_v49, %v289_v48 }
 0x2b5   :  { %v292_v51 = vrot.slane %v291_v50, 1 }
 0x2b7   :  { %v293_v52 = vadd.f32 %v292_v51, %v291_v50 }
 0x2b9   :  { %400 = vpush %v293_v52 }
 0x2ea   :  { %s401_s16 = spop %400 }
 0x2eb   :  { %v295_v53 = vstv %s401_s16 }
 0x2ec   :  { %296 = vst [vmem:[#allocation7] sm:$0xff] %v295_v53 }
 0x2ed   :  { %307 = dma.vmem_to_hbm [thread:$0]  %s303_s4, 128, %s305_s15, [#allocation4]  }
 0x2ee   :  { %491 = dma.done.wait [#allocation4], 128  }
 0x2ef   :  { %492 = vsyncadd [#allocation4], 4294967168 }
 0x2f0   :  { %312 = vsyncpa [#allocation3], 1 }
 0x2f1   :  { %313 = vsyncpa [#allocation6], 1 }
 0x2f2   :  { %314 = vsyncpa [#allocation4], 1 }

// kernel: tpu_custom_call.1
= control target key start
LH: loop header
LB: loop body
LE: loop exit
PB: predicated region body
PF: predicated region fallthrough
CT: control target
= control target key end

     0   :  { %11 = vsyncpa [#allocation3], 0  ;;  %s555_s0 = inlined_call_operand.vmem [shape: bf16[16,128], index: 0, kind: input, shape index: {}]   ;;  %s556_s1 = inlined_call_operand.hbm [shape: bf16[128,128], index: 1, kind: input, shape index: {}]   ;;  %s557_s2 = inlined_call_operand.vmem [shape: f32[1,128], index: 2, kind: input, shape index: {}]   ;;  %s558_s3 = inlined_call_operand.hbm [shape: bf16[128,128], index: 3, kind: input, shape index: {}]   ;;  %s559_s4 = inlined_call_operand.vmem [shape: f32[1,128], index: 4, kind: input, shape index: {}]   ;;  %s560_s5 = inlined_call_operand.vmem [shape: s32[16,1], index: 5, kind: input, shape index: {}]   ;;  %s561_s6 = inlined_call_operand.hbm [shape: f32[1,8,128], index: 6, kind: output, shape index: {}]  }
   0x1   :  { %12 = vsyncpa [#allocation6], 0 }
   0x2   :  { %13 = vsyncpa [#allocation4], 0  ;;  %s20_s23 = sshll.u32 %s556_s1, 4  ;;  %s493_s24 = smov [#allocation2]   ;;  %s21_s23 = int_to_ptr.hbm [resolvable:$true] %s20_s23 }
   0x3   :  { %s22_s25 = sshll.u32 %s493_s24, 4  ;;  %s35_s28 = sshll.u32 %s558_s3, 4  ;;  %s23_s25 = int_to_ptr.vmem [resolvable:$true] %s22_s25  ;;  %s36_s28 = int_to_ptr.hbm [resolvable:$true] %s35_s28 }
   0x4   :  { %s494_s29 = smov 64   ;;  %s495_s30 = smov 4  }
   0x5   :  { %28 = dma.hbm_to_vmem [thread:$0]  %s21_s23, 1024, %s23_s25, [#allocation3], %s494_s29, %s494_s29, %s495_s30  }
   0x6   :  { %s496_s7 = smov [#allocation5]  }
   0x7   :  { %s37_s8 = sshll.u32 %s496_s7, 4  ;;  %s38_s8 = int_to_ptr.vmem [resolvable:$true] %s37_s8 }
   0x8   :  { %43 = dma.hbm_to_vmem [thread:$0]  %s36_s28, 1024, %s38_s8, [#allocation6], %s494_s29, %s494_s29, %s495_s30  }
   0x9   :  { %487 = dma.done.wait [#allocation3], 1024  }
   0xa   :  { %488 = vsyncadd [#allocation3], 4294966272 }
   0xb   :  { %489 = dma.done.wait [#allocation6], 1024  }
   0xc   :  { %490 = vsyncadd [#allocation6], 4294966272  ;;  %v391_v0 = vld [vmem:[#allocation2 + $0x38] sm:$0xff]  ;;  %v390_v1 = vld [vmem:[#allocation2 + $0x30] sm:$0xff]  ;;  %v497_v25 = vmov 0   ;;  %v251_v35 = vlaneseq  ;;  %vm282_vm1 = vcmask 7168  }
   0xd   :  { %132 = vmatpush.bf16.msra.mxu0 %v391_v0  ;;  %v399_v2 = vld [vmem:[#allocation5 + $0x38] sm:$0xff]  ;;  %v398_v3 = vld [vmem:[#allocation5 + $0x30] sm:$0xff]  ;;  %v389_v4 = vld [vmem:[#allocation2 + $0x28] sm:$0xff]  ;;  %408 = vset.pattern.permute.xlu0 %v497_v25  ;;  %s304_s15 = sshll.u32 %s561_s6, 4  ;;  %s305_s15 = int_to_ptr.hbm [resolvable:$true] %s304_s15 }
   0xe   :  { %217 = vmatpush.bf16.msra.mxu1 %v399_v2  ;;  %v397_v5 = vld [vmem:[#allocation5 + $0x28] sm:$0xff]  ;;  %v388_v6 = vld [vmem:[#allocation2 + $0x20] sm:$0xff]  ;;  %v387_v8 = vld [vmem:[#allocation2 + $0x18] sm:$0xff]  ;;  %v252_v36 = vand.u32 127, %v251_v35 }
   0xf   :  { %v396_v7 = vld [vmem:[#allocation5 + $0x20] sm:$0xff]  ;;  %v386_v9 = vld [vmem:[#allocation2 + $0x10] sm:$0xff]  ;;  %v385_v10 = vld [vmem:[#allocation2 + $0x8] sm:$0xff] }
  0x10   :  { %v384_v11 = vld [vmem:[#allocation2] sm:$0xff]  ;;  %v395_v13 = vld [vmem:[#allocation5 + $0x18] sm:$0xff]  ;;  %v394_v14 = vld [vmem:[#allocation5 + $0x10] sm:$0xff] }
  0x11   :  { %133 = vmatpush.bf16.msra.mxu0 %v390_v1  ;;  %v383_v12 = vld [vmem:[%s555_s0] sm:$0xff]  ;;  %v393_v15 = vld [vmem:[#allocation5 + $0x8] sm:$0xff] }
  0x12   :  { %218 = vmatpush.bf16.msra.mxu1 %v398_v3  ;;  %v392_v16 = vld [vmem:[#allocation5] sm:$0xff] }
  0x13   :  { %v409_v18 = vld [vmem:[%s557_s2] ss:$0 sm:$0xff]  ;;  %s498_s2 = smov [#allocation7]  }
  0x14   :  { %v410_v26 = vld [vmem:[%s559_s4] ss:$0 sm:$0xff]  ;;  %s302_s4 = sshll.u32 %s498_s2, 4  ;;  %s303_s4 = int_to_ptr.vmem [resolvable:$true] %s302_s4 }
  0x15   :  { %134 = vmatpush.bf16.msra.mxu0 %v389_v4  ;;  %v253_v30 = vld [vmem:[%s560_s5] sm:$0xff] }
  0x16   :  { %219 = vmatpush.bf16.msra.mxu1 %v397_v5 }
  0x19   :  { %135 = vmatpush.bf16.msra.mxu0 %v388_v6 }
  0x1a   :  { %220 = vmatpush.bf16.msra.mxu1 %v396_v7 }
  0x1d   :  { %136 = vmatpush.bf16.msra.mxu0 %v387_v8 }
  0x1e   :  { %221 = vmatpush.bf16.msra.mxu1 %v395_v13 }
  0x21   :  { %137 = vmatpush.bf16.msra.mxu0 %v386_v9 }
  0x22   :  { %222 = vmatpush.bf16.msra.mxu1 %v394_v14 }
  0x25   :  { %138 = vmatpush.bf16.msra.mxu0 %v385_v10 }
  0x26   :  { %223 = vmatpush.bf16.msra.mxu1 %v393_v15 }
  0x29   :  { %139 = vmatpush.bf16.msra.mxu0 %v384_v11 }
  0x2a   :  { %224 = vmatpush.bf16.msra.mxu1 %v392_v16 }
  0x2c   :  { %140 = vmatmul.bf16.vlgmr.msra.gmra.mxu0 %v383_v12 }
  0xa9   :  { %v141_v17 = vpop.f32.mrf.mxu0 }
  0xaa   :  { %v142_v19 = vadd.f32 %v409_v18, %v141_v17 }
  0xac   :  { %v146_v22 = vmax.f32 %v142_v19, 0.0 }
  0xb1   :  { %v143_v20 = vpop.f32.mrf.mxu0 }
  0xb2   :  { %v144_v21 = vadd.f32 %v409_v18, %v143_v20 }
  0xb4   :  { %v147_v23 = vmax.f32 %v144_v21, 0.0 }
  0xb6   :  { %v148_v24 = vpack.c.bf16 %v147_v23, %v146_v22 }
  0xb8   :  { %225 = vmatmul.bf16.vlgmr.msra.gmra.mxu1 %v148_v24 }
 0x135   :  { %v226_v27 = vpop.f32.mrf.mxu1 }
 0x136   :  { %v227_v28 = vadd.f32 %v410_v26, %v226_v27 }
 0x138   :  { %231 = vmax.xlane.f32.xlu0 %v227_v28 }
 0x13d   :  { %v228_v29 = vpop.f32.mrf.mxu1 }
 0x14c   :  { %256 = vperm.xlu0 %408, %v253_v30  }
 0x1ab   :  { %v232_v31 = vpop.xlane.xlu0 %231 }
 0x1ac   :  { %v235_v32 = vsub.f32 %v227_v28, %v232_v31 }
 0x1ae   :  { %v237_v33 = vmul.f32 1.442695, %v235_v32 }
 0x1b0   :  { %411 = vpow2.f32 %v237_v33 }
 0x1b6   :  { %v412_v34 = vpop.eup %411 }
 0x1b7   :  { %241 = vadd.xlane.f32.xlu1 %v412_v34 }
 0x1be   :  { %v257_v37 = vpop.permute.xlu0 %256 }
 0x1bf   :  { %vm261_vm0 = vcmp.eq.s32.totalorder %v252_v36, %v257_v37 }
 0x1c0   :  { %v263_v38 = vsel %vm261_vm0, %v227_v28, 0.0 }
 0x1c1   :  { %265 = vadd.xlane.f32.xlu1 %v263_v38 }
 0x22a   :  { %v242_v39 = vpop.xlane.xlu1 %241 }
 0x22b   :  { %413 = vlog2.f32 %v242_v39 }
 0x231   :  { %v414_v40 = vpop.eup %413 }
 0x232   :  { %v246_v41 = vmul.f32 0.6931472, %v414_v40 }
 0x234   :  { %v249_v42 = vadd.f32 %v246_v41, %v232_v31  ;;  %v266_v43 = vpop.xlane.xlu1 %265 }
 0x236   :  { %v269_v44 = vsub.f32 %v249_v42, %v266_v43 }
 0x238   :  { %v283_v45 = vsel %vm282_vm1, %v269_v44, 0.0 }
 0x239   :  { %286 = vadd.xlane.f32.xlu2 %v283_v45 }
 0x2ac   :  { %v287_v46 = vpop.xlane.xlu2 %286 }
 0x2ad   :  { %v288_v47 = vrot.slane %v287_v46, 4 }
 0x2af   :  { %v289_v48 = vadd.f32 %v288_v47, %v287_v46 }
 0x2b1   :  { %v290_v49 = vrot.slane %v289_v48, 2 }
 0x2b3   :  { %v291_v50 = vadd.f32 %v290_v49, %v289_v48 }
 0x2b5   :  { %v292_v51 = vrot.slane %v291_v50, 1 }
 0x2b7   :  { %v293_v52 = vadd.f32 %v292_v51, %v291_v50 }
 0x2b9   :  { %400 = vpush %v293_v52 }
 0x2ea   :  { %s401_s16 = spop %400 }
 0x2eb   :  { %v295_v53 = vstv %s401_s16 }
 0x2ec   :  { %296 = vst [vmem:[#allocation7] sm:$0xff] %v295_v53 }
 0x2ed   :  { %307 = dma.vmem_to_hbm [thread:$0]  %s303_s4, 128, %s305_s15, [#allocation4]  }
 0x2ee   :  { %491 = dma.done.wait [#allocation4], 128  }
 0x2ef   :  { %492 = vsyncadd [#allocation4], 4294967168 }
 0x2f0   :  { %312 = vsyncpa [#allocation3], 1 }
 0x2f1   :  { %313 = vsyncpa [#allocation6], 1 }
 0x2f2   :  { %314 = vsyncpa [#allocation4], 1 }

</bundles_post_ra>
